<compile_context>
chip_gen: v5e
topology: v5e:2x2
jax: 0.10.0
libtpu: 0.0.40
codegen_flags: <defaults>
</compile_context>

<pallas_src>
import functools
import math

import jax
import jax.numpy as jnp
from jax.experimental import pallas as pl
from jax.experimental.pallas import tpu as pltpu

LN_EPS = 1e-5
ACT_DT = jnp.bfloat16      # inter-kernel activation dtype
W_DT = jnp.bfloat16        # matmul weight storage dtype


# --------------------------------- helpers --------------------------------------
def _layernorm(x, gamma, beta):
    mu = jnp.mean(x, axis=-1, keepdims=True)
    var = jnp.mean((x - mu) ** 2, axis=-1, keepdims=True)
    return (x - mu) * jax.lax.rsqrt(var + LN_EPS) * gamma + beta


def _gelu(x):
    # TODO(synk): HF RoBERTa uses exact erf-GELU; tanh approximation used for robust Mosaic lowering.
    return jax.nn.gelu(x, approximate=True)


def _seq_tile(seq_len, target=128):
    """Largest multiple-of-8 tile <= target dividing seq_len (else full sequence)."""
    if seq_len <= target:
        return seq_len
    for t in range(target, 7, -8):
        if seq_len % t == 0:
            return t
    return seq_len


@functools.lru_cache(maxsize=None)
def _buffered_one_supported():
    """Probe whether pipeline_mode=pl.Buffered(1) (single-buffered constants) lowers/runs."""
    try:
        spec = pl.BlockSpec((8, 128), lambda i: (0, 0), pipeline_mode=pl.Buffered(1))

        def _k(x_ref, o_ref):
            o_ref[...] = x_ref[...] + 1.0

        out = pl.pallas_call(
            _k,
            out_shape=jax.ShapeDtypeStruct((8, 128), jnp.float32),
            grid=(1,),
            in_specs=[spec],
            out_specs=pl.BlockSpec((8, 128), lambda i: (0, 0)),
        )(jnp.zeros((8, 128), jnp.float32))
        jax.block_until_ready(out)
        return True
    except Exception:
        return False


def _const_spec(shape):
    """BlockSpec for a grid-invariant operand (same block every step): single-buffer it."""
    index_map = lambda *_: (0,) * len(shape)
    if _buffered_one_supported():
        return pl.BlockSpec(shape, index_map, pipeline_mode=pl.Buffered(1))
    return pl.BlockSpec(shape, index_map)


def _vmem_limit(entries, headroom=2 * 1024 * 1024):
    """Explicit scoped-VMEM budget from (shape, dtype, n_buffers) entries."""
    total = headroom
    for shape, dtype, nbuf in entries:
        n = jnp.dtype(dtype).itemsize
        for d in shape:
            n *= int(d)
        total += n * nbuf
    # floor covers small-shape tile padding / compiler scratch; cap fits every generation.
    return int(min(max(total, 16 * 1024 * 1024), 64 * 1024 * 1024))


def _cparams(vmem_bytes, n_grid=2):
    return pltpu.CompilerParams(
        dimension_semantics=("parallel",) * n_grid,
        vmem_limit_bytes=int(vmem_bytes))


# ------------------------- QKV projection (+ fused embed LN) ---------------------
def qkv_kernel(*refs, nh, hd, apply_ln):
    if apply_ln:
        (x_ref, g_ref, b_ref, wq_ref, bq_ref, wk_ref, bk_ref, wv_ref, bv_ref,
         q_ref, k_ref, v_ref, xn_ref) = refs
    else:
        (x_ref, wq_ref, bq_ref, wk_ref, bk_ref, wv_ref, bv_ref,
         q_ref, k_ref, v_ref) = refs

    if apply_ln:
        xn = _layernorm(x_ref[0].astype(jnp.float32), g_ref[...], b_ref[...])
        xn_ref[0] = xn.astype(xn_ref.dtype)
        xb = xn.astype(jnp.bfloat16)
    else:
        xb = x_ref[0].astype(jnp.bfloat16)                      # (tq, H)

    q = jnp.dot(xb, wq_ref[...], preferred_element_type=jnp.float32) + bq_ref[...]
    k = jnp.dot(xb, wk_ref[...], preferred_element_type=jnp.float32) + bk_ref[...]
    v = jnp.dot(xb, wv_ref[...], preferred_element_type=jnp.float32) + bv_ref[...]

    # Write head-major (nh, tq, hd) via static per-head lane slices (no transpose op).
    for h in range(nh):
        sl = slice(h * hd, (h + 1) * hd)
        q_ref[0, h] = q[:, sl].astype(q_ref.dtype)
        k_ref[0, h] = k[:, sl].astype(k_ref.dtype)
        v_ref[0, h] = v[:, sl].astype(v_ref.dtype)


def qkv_proj(x, p, num_heads, tq, emb_ln=None):
    """x:(B,S,H) -> q,k,v:(B,nh,S,hd) head-major [+ normalized x when emb_ln given]."""
    B, S, H = x.shape
    hd = H // num_heads
    apply_ln = emb_ln is not None
    grid = (B, S // tq)

    x_spec = pl.BlockSpec((1, tq, H), lambda b, s: (b, s, 0))
    head_spec = pl.BlockSpec((1, num_heads, tq, hd), lambda b, s: (b, 0, s, 0))

    in_specs, args = [x_spec], [x]
    if apply_ln:
        in_specs += [_const_spec((1, H)), _const_spec((1, H))]
        args += [emb_ln[0], emb_ln[1]]
    for wn, bn in (("wq", "bq"), ("wk", "bk"), ("wv", "bv")):
        in_specs += [_const_spec((H, H)), _const_spec((1, H))]
        args += [p[wn], p[bn]]

    out_shapes = [jax.ShapeDtypeStruct((B, num_heads, S, hd), ACT_DT)] * 3
    out_specs = [head_spec] * 3
    if apply_ln:
        out_shapes.append(jax.ShapeDtypeStruct((B, S, H), ACT_DT))
        out_specs.append(pl.BlockSpec((1, tq, H), lambda b, s: (b, s, 0)))

    wb = 1 if _buffered_one_supported() else 2
    vmem = _vmem_limit([
        ((tq, H), x.dtype, 2),                        # x tile (double-buffered)
        ((num_heads, tq, hd), ACT_DT, 6),             # q/k/v outputs
        ((tq, H), ACT_DT, 2 if apply_ln else 0),      # normalized-x output
        ((H, 3 * H), W_DT, wb), ((1, 6 * H), jnp.float32, wb),   # weights / biases / LN
        ((tq, 3 * H), jnp.float32, 1),                # in-kernel q/k/v temporaries
    ])

    kernel = functools.partial(qkv_kernel, nh=num_heads, hd=hd, apply_ln=apply_ln)
    return pl.pallas_call(
        kernel,
        out_shape=tuple(out_shapes),
        grid=grid,
        in_specs=in_specs,
        out_specs=tuple(out_specs),
        compiler_params=_cparams(vmem),
    )(*args)


# -------------------- attention core + out-proj + residual + LN1 -----------------
def attn_kernel(q_ref, k_ref, v_ref, x_ref, mask_ref, wo_ref, bo_ref,
                g_ref, b_ref, o_ref, ctx_sc, *, nh, hd, scale):
    q = q_ref[0]                                   # (nh, tq, hd) bf16
    k = k_ref[0]                                   # (nh, S,  hd) bf16
    v = v_ref[0]                                   # (nh, S,  hd) bf16
    attn_bias = ((1.0 - mask_ref[0]) * (-1e9))[None]   # (1, 1, S) f32, built once

    # batched per-head contraction; K-"transpose" folded into contraction dims.
    s = jnp.einsum("hqd,hkd->hqk", q, k,
                   preferred_element_type=jnp.float32) * scale
    s = s + attn_bias
    s = s - jnp.max(s, axis=-1, keepdims=True)
    p = jnp.exp(s)
    p = p * pl.reciprocal(jnp.sum(p, axis=-1, keepdims=True), approx=True)
    ctx = jnp.einsum("hqk,hkd->hqd", p.astype(v.dtype), v,
                     preferred_element_type=jnp.float32)        # (nh, tq, hd)

    # merge heads into a (tq, H) scratch slab (no concatenate / transpose).
    for h in range(nh):
        ctx_sc[:, h * hd:(h + 1) * hd] = ctx[h]

    attn_out = (jnp.dot(ctx_sc[...].astype(jnp.bfloat16), wo_ref[...],
                        preferred_element_type=jnp.float32) + bo_ref[...])
    x1 = _layernorm(x_ref[0].astype(jnp.float32) + attn_out, g_ref[...], b_ref[...])
    o_ref[0] = x1.astype(o_ref.dtype)


def attention_block(q, k, v, x, mask, p, tq):
    B, nh, S, hd = q.shape
    H = nh * hd
    grid = (B, S // tq)
    wb = 1 if _buffered_one_supported() else 2
    # TODO(synk): for very long sequences switch to a flash-style online softmax
    # over key tiles; full-S scores per query tile are kept here.
    vmem = _vmem_limit([
        ((nh, tq, hd), ACT_DT, 2), ((nh, S, hd), ACT_DT, 4),     # q tile, full K/V
        ((tq, H), x.dtype, 2), ((1, S), jnp.float32, 2),         # residual, mask
        ((H, H), W_DT, wb), ((1, 3 * H), jnp.float32, wb),       # wo, bo, LN
        ((tq, H), ACT_DT, 2),                                    # output
        ((nh, tq, S), jnp.float32, 2),                           # scores / probs temps
        ((tq, H), jnp.float32, 1),                               # ctx scratch
    ])

    kernel = functools.partial(attn_kernel, nh=nh, hd=hd, scale=1.0 / math.sqrt(hd))
    return pl.pallas_call(
        kernel,
        out_shape=jax.ShapeDtypeStruct((B, S, H), ACT_DT),
        grid=grid,
        in_specs=[
            pl.BlockSpec((1, nh, tq, hd), lambda b, s: (b, 0, s, 0)),   # q tile
            pl.BlockSpec((1, nh, S, hd), lambda b, s: (b, 0, 0, 0)),    # full K
            pl.BlockSpec((1, nh, S, hd), lambda b, s: (b, 0, 0, 0)),    # full V
            pl.BlockSpec((1, tq, H), lambda b, s: (b, s, 0)),           # residual x
            pl.BlockSpec((1, 1, S), lambda b, s: (b, 0, 0)),            # key mask
            _const_spec((H, H)), _const_spec((1, H)),                   # wo, bo
            _const_spec((1, H)), _const_spec((1, H)),                   # ln1 gamma/beta
        ],
        out_specs=pl.BlockSpec((1, tq, H), lambda b, s: (b, s, 0)),
        scratch_shapes=[pltpu.VMEM((tq, H), jnp.float32)],
        compiler_params=_cparams(vmem),
    )(q, k, v, x, mask, p["wo"], p["bo"], p["ln1_g"], p["ln1_b"])


# --------------------------- FFN + residual + LN2 --------------------------------
def ffn_kernel(x_ref, wi_ref, bi_ref, wf_ref, bf_ref, g_ref, b_ref, o_ref):
    x = x_ref[0]                                                   # (tq, H) bf16
    h = jnp.dot(x, wi_ref[...], preferred_element_type=jnp.float32) + bi_ref[...]
    h = _gelu(h)
    y = (jnp.dot(h.astype(wf_ref.dtype), wf_ref[...],
                 preferred_element_type=jnp.float32) + bf_ref[...])
    out = _layernorm(x.astype(jnp.float32) + y, g_ref[...], b_ref[...])
    o_ref[0] = out.astype(o_ref.dtype)


def ffn_block(x, p, tq):
    B, S, H = x.shape
    F = p["wi"].shape[1]
    grid = (B, S // tq)
    wb = 1 if _buffered_one_supported() else 2
    # TODO(synk): at xlm-roberta-large scale, optionally add a third grid axis over F
    # if the (H,F)+(F,H) bf16 weight slabs need to shrink further for v7x.
    vmem = _vmem_limit([
        ((tq, H), ACT_DT, 4),                                     # x in + out
        ((tq, F), jnp.float32, 2),                                # intermediate
        ((H, F), W_DT, wb), ((F, H), W_DT, wb),                   # wi, wf
        ((1, F), jnp.float32, wb), ((1, 3 * H), jnp.float32, wb), # biases, LN
    ])
    return pl.pallas_call(
        ffn_kernel,
        out_shape=jax.ShapeDtypeStruct((B, S, H), ACT_DT),
        grid=grid,
        in_specs=[
            pl.BlockSpec((1, tq, H), lambda b, s: (b, s, 0)),
            _const_spec((H, F)), _const_spec((1, F)),
            _const_spec((F, H)), _const_spec((1, H)),
            _const_spec((1, H)), _const_spec((1, H)),
        ],
        out_specs=pl.BlockSpec((1, tq, H), lambda b, s: (b, s, 0)),
        compiler_params=_cparams(vmem),
    )(x, p["wi"], p["bi"], p["wf"], p["bf"], p["ln2_g"], p["ln2_b"])


# -------------------------------- classifier -------------------------------------
def classifier_kernel(x_ref, w_ref, b_ref, o_ref):
    o_ref[0] = (jnp.dot(x_ref[0], w_ref[...], preferred_element_type=jnp.float32)
                + b_ref[...]).astype(o_ref.dtype)


def classifier(x, w, b, num_tags, tq):
    B, S, H = x.shape
    T = num_tags
    Tp = ((T + 127) // 128) * 128                 # lane-dense output slab
    if Tp != T:
        w = jnp.pad(w, ((0, 0), (0, Tp - T)))
        b = jnp.pad(b, ((0, 0), (0, Tp - T)))
    grid = (B, S // tq)
    wb = 1 if _buffered_one_supported() else 2
    vmem = _vmem_limit([
        ((tq, H), ACT_DT, 2), ((tq, Tp), jnp.float32, 2),
        ((H, Tp), W_DT, wb), ((1, Tp), jnp.float32, wb),
    ])
    logits = pl.pallas_call(
        classifier_kernel,
        out_shape=jax.ShapeDtypeStruct((B, S, Tp), jnp.float32),
        grid=grid,
        in_specs=[
            pl.BlockSpec((1, tq, H), lambda b_, s: (b_, s, 0)),
            _const_spec((H, Tp)), _const_spec((1, Tp)),
        ],
        out_specs=pl.BlockSpec((1, tq, Tp), lambda b_, s: (b_, s, 0)),
        compiler_params=_cparams(vmem),
    )(x, w, b)
    return logits[..., :T]


# --------------------------- parameters & forward --------------------------------
def init_params(key, cfg):
    H, F, L = cfg["hidden"], cfg["ffn"], cfg["num_layers"]
    V, P, T = cfg["vocab"], cfg["max_pos"], cfg["num_tags"]

    def nrm(k, shape, dtype=W_DT):
        return (0.02 * jax.random.normal(k, shape)).astype(dtype)

    keys = jax.random.split(key, 4 + 6 * L)
    params = {
        "word_emb": nrm(keys[0], (V, H), jnp.float32),
        "pos_emb":  nrm(keys[1], (P, H), jnp.float32),
        "type_emb": nrm(keys[2], (1, H), jnp.float32),
        "emb_ln_g": jnp.ones((1, H), jnp.float32),
        "emb_ln_b": jnp.zeros((1, H), jnp.float32),
        "cls_w":    nrm(keys[3], (H, T)),
        "cls_b":    jnp.zeros((1, T), jnp.float32),
        "layers":   [],
    }
    for i in range(L):
        ks = keys[4 + 6 * i: 4 + 6 * (i + 1)]
        params["layers"].append({
            "wq": nrm(ks[0], (H, H)), "bq": jnp.zeros((1, H), jnp.float32),
            "wk": nrm(ks[1], (H, H)), "bk": jnp.zeros((1, H), jnp.float32),
            "wv": nrm(ks[2], (H, H)), "bv": jnp.zeros((1, H), jnp.float32),
            "wo": nrm(ks[3], (H, H)), "bo": jnp.zeros((1, H), jnp.float32),
            "ln1_g": jnp.ones((1, H), jnp.float32), "ln1_b": jnp.zeros((1, H), jnp.float32),
            "wi": nrm(ks[4], (H, F)), "bi": jnp.zeros((1, F), jnp.float32),
            "wf": nrm(ks[5], (F, H)), "bf": jnp.zeros((1, H), jnp.float32),
            "ln2_g": jnp.ones((1, H), jnp.float32), "ln2_b": jnp.zeros((1, H), jnp.float32),
        })
    return params


def pos_model_forward(params, input_ids, attention_mask, cfg):
    B, S = input_ids.shape
    nh = cfg["num_heads"]
    pad = cfg["pad_idx"]
    tq = _seq_tile(S)

    # RoBERTa position ids: cumsum over non-pad tokens, offset by padding_idx.
    not_pad = (input_ids != pad).astype(jnp.int32)
    position_ids = jnp.cumsum(not_pad, axis=1) * not_pad + pad

    # Embedding gathers stay in plain JAX (glue); everything else is Pallas.
    emb = (params["word_emb"][input_ids]
           + params["pos_emb"][position_ids]
           + params["type_emb"][0][None, None, :]).astype(jnp.float32)
    mask = attention_mask.astype(jnp.float32).reshape(B, 1, S)

    x = emb
    for i, lp in enumerate(params["layers"]):
        if i == 0:
            # embedding LayerNorm is fused into the first layer's QKV kernel.
            q, k, v, x = qkv_proj(x, lp, nh, tq,
                                  emb_ln=(params["emb_ln_g"], params["emb_ln_b"]))
        else:
            q, k, v = qkv_proj(x, lp, nh, tq)
        x = attention_block(q, k, v, x, mask, lp, tq)
        x = ffn_block(x, lp, tq)

    # dropout(0.3): identity at inference time.
    return classifier(x, params["cls_w"], params["cls_b"], cfg["num_tags"], tq)


# ------------------------------ pure-JAX reference --------------------------------
def reference_forward(params, input_ids, attention_mask, cfg):
    H, nh = cfg["hidden"], cfg["num_heads"]
    hd = H // nh
    pad = cfg["pad_idx"]
    B, S = input_ids.shape
    f32 = lambda a: a.astype(jnp.float32)

    not_pad = (input_ids != pad).astype(jnp.int32)
    position_ids = jnp.cumsum(not_pad, axis=1) * not_pad + pad
    x = (params["word_emb"][input_ids] + params["pos_emb"][position_ids]
         + params["type_emb"][0][None, None, :]).astype(jnp.float32)
    x = _layernorm(x, params["emb_ln_g"], params["emb_ln_b"])
    bias = (1.0 - attention_mask.astype(jnp.float32))[:, None, None, :] * (-1e9)

    for lp in params["layers"]:
        q = x @ f32(lp["wq"]) + lp["bq"]
        k = x @ f32(lp["wk"]) + lp["bk"]
        v = x @ f32(lp["wv"]) + lp["bv"]
        split = lambda t: t.reshape(B, S, nh, hd).transpose(0, 2, 1, 3)
        s = jnp.einsum("bhqd,bhkd->bhqk", split(q), split(k)) / math.sqrt(hd) + bias
        p = jax.nn.softmax(s, axis=-1)
        ctx = jnp.einsum("bhqk,bhkd->bhqd", p, split(v)).transpose(0, 2, 1, 3).reshape(B, S, H)
        attn = ctx @ f32(lp["wo"]) + lp["bo"]
        x = _layernorm(x + attn, lp["ln1_g"], lp["ln1_b"])
        h = _gelu(x @ f32(lp["wi"]) + lp["bi"])
        y = h @ f32(lp["wf"]) + lp["bf"]
        x = _layernorm(x + y, lp["ln2_g"], lp["ln2_b"])
    return x @ f32(params["cls_w"]) + params["cls_b"]


if __name__ == "__main__":
    cfg = dict(vocab=100, hidden=32, ffn=64, num_layers=2, num_heads=4,
               max_pos=64, pad_idx=1, num_tags=16)
    B, S = 2, 8

    key = jax.random.PRNGKey(0)
    k_param, k_ids = jax.random.split(key)
    params = init_params(k_param, cfg)

    input_ids = jax.random.randint(k_ids, (B, S), 2, cfg["vocab"], dtype=jnp.int32)
    attention_mask = jnp.ones((B, S), jnp.int32)
    # make the tail of the second sequence padding
    input_ids = input_ids.at[1, -2:].set(cfg["pad_idx"])
    attention_mask = attention_mask.at[1, -2:].set(0)

    logits = pos_model_forward(params, input_ids, attention_mask, cfg)
    logits = jax.block_until_ready(logits)
    assert logits.shape == (B, S, cfg["num_tags"])
    assert bool(jnp.all(jnp.isfinite(logits)))

    ref = reference_forward(params, input_ids, attention_mask, cfg)
    err = float(jnp.max(jnp.abs(logits - ref)))
    assert err < 3e-2, f"kernel vs reference mismatch: max abs err {err}"

    print("KERNEL_OK")
</pallas_src>

<mosaic_0001>
module attributes {stable_mosaic.version = 11 : i64} {
  func.func @_k(%arg0: i32, %arg1: memref<8x128xf32, #tpu.memory_space<vmem>>, %arg2: memref<8x128xf32, #tpu.memory_space<vmem>>) attributes {dimension_semantics = [#tpu.dimension_semantics<arbitrary>], iteration_bounds = array<i64: 1>, scalar_prefetch = 0 : i64, scratch_operands = 0 : i64, tpu.core_type = #tpu.core_type<tc>, window_params = [{pipeline_mode = #tpu.pipeline_mode<synchronous>, transform_indices = @transform_0, window_bounds = array<i64: 8, 128>}, {pipeline_mode = #tpu.pipeline_mode<synchronous>, transform_indices = @transform_1, window_bounds = array<i64: 8, 128>}]} {
    %c0 = arith.constant 0 : index
    %c0_0 = arith.constant 0 : index
    %0 = vector.load %arg1[%c0, %c0_0] : memref<8x128xf32, #tpu.memory_space<vmem>>, vector<8x128xf32>
    %cst = arith.constant 1.000000e+00 : f32
    %1 = vector.broadcast %cst : f32 to vector<8x128xf32>
    %2 = arith.addf %0, %1 : vector<8x128xf32>
    %c0_1 = arith.constant 0 : index
    %c0_2 = arith.constant 0 : index
    %3 = vector.load %arg2[%c0_1, %c0_2] : memref<8x128xf32, #tpu.memory_space<vmem>>, vector<8x128xf32>
    tpu.vector_store %arg2[%c0_1, %c0_2], %2 {strides = array<i32>} : memref<8x128xf32, #tpu.memory_space<vmem>>, vector<8x128xf32>,
    return
  }
  func.func @transform_0(%arg0: i32) -> (i32, i32) {
    %c0_i32 = arith.constant 0 : i32
    %c0_i32_0 = arith.constant 0 : i32
    %c0_i32_1 = arith.constant 0 : i32
    return %c0_i32, %c0_i32_0 : i32, i32
  }
  func.func @transform_1(%arg0: i32) -> (i32, i32) {
    %c0_i32 = arith.constant 0 : i32
    %c0_i32_0 = arith.constant 0 : i32
    %c0_i32_1 = arith.constant 0 : i32
    return %c0_i32, %c0_i32_0 : i32, i32
  }
}

module attributes {stable_mosaic.version = 11 : i64} {
  func.func @qkv_kernel(%arg0: i32, %arg1: i32, %arg2: memref<1x8x32xf32, #tpu.memory_space<vmem>>, %arg3: memref<1x32xf32, #tpu.memory_space<vmem>>, %arg4: memref<1x32xf32, #tpu.memory_space<vmem>>, %arg5: memref<32x32xbf16, #tpu.memory_space<vmem>>, %arg6: memref<1x32xf32, #tpu.memory_space<vmem>>, %arg7: memref<32x32xbf16, #tpu.memory_space<vmem>>, %arg8: memref<1x32xf32, #tpu.memory_space<vmem>>, %arg9: memref<32x32xbf16, #tpu.memory_space<vmem>>, %arg10: memref<1x32xf32, #tpu.memory_space<vmem>>, %arg11: memref<1x4x8x8xbf16, #tpu.memory_space<vmem>>, %arg12: memref<1x4x8x8xbf16, #tpu.memory_space<vmem>>, %arg13: memref<1x4x8x8xbf16, #tpu.memory_space<vmem>>, %arg14: memref<1x8x32xbf16, #tpu.memory_space<vmem>>) attributes {dimension_semantics = [#tpu.dimension_semantics<parallel>, #tpu.dimension_semantics<parallel>], iteration_bounds = array<i64: 2, 1>, scalar_prefetch = 0 : i64, scratch_operands = 0 : i64, tpu.core_type = #tpu.core_type<tc>, window_params = [{transform_indices = @transform_0, window_bounds = array<i64: 1, 8, 32>}, {pipeline_mode = #tpu.pipeline_mode<synchronous>, transform_indices = @transform_1, window_bounds = array<i64: 1, 32>}, {pipeline_mode = #tpu.pipeline_mode<synchronous>, transform_indices = @transform_2, window_bounds = array<i64: 1, 32>}, {pipeline_mode = #tpu.pipeline_mode<synchronous>, transform_indices = @transform_3, window_bounds = array<i64: 32, 32>}, {pipeline_mode = #tpu.pipeline_mode<synchronous>, transform_indices = @transform_4, window_bounds = array<i64: 1, 32>}, {pipeline_mode = #tpu.pipeline_mode<synchronous>, transform_indices = @transform_5, window_bounds = array<i64: 32, 32>}, {pipeline_mode = #tpu.pipeline_mode<synchronous>, transform_indices = @transform_6, window_bounds = array<i64: 1, 32>}, {pipeline_mode = #tpu.pipeline_mode<synchronous>, transform_indices = @transform_7, window_bounds = array<i64: 32, 32>}, {pipeline_mode = #tpu.pipeline_mode<synchronous>, transform_indices = @transform_8, window_bounds = array<i64: 1, 32>}, {transform_indices = @transform_9, window_bounds = array<i64: 1, 4, 8, 8>}, {transform_indices = @transform_10, window_bounds = array<i64: 1, 4, 8, 8>}, {transform_indices = @transform_11, window_bounds = array<i64: 1, 4, 8, 8>}, {transform_indices = @transform_12, window_bounds = array<i64: 1, 8, 32>}]} {
    %c0 = arith.constant 0 : index
    %c0_0 = arith.constant 0 : index
    %c0_1 = arith.constant 0 : index
    %0 = vector.load %arg2[%c0, %c0_0, %c0_1] : memref<1x8x32xf32, #tpu.memory_space<vmem>>, vector<1x8x32xf32>
    %1 = vector.shape_cast %0 : vector<1x8x32xf32> to vector<8x32xf32>
    %c0_2 = arith.constant 0 : index
    %c0_3 = arith.constant 0 : index
    %2 = vector.load %arg3[%c0_2, %c0_3] : memref<1x32xf32, #tpu.memory_space<vmem>>, vector<1x32xf32>
    %c0_4 = arith.constant 0 : index
    %c0_5 = arith.constant 0 : index
    %3 = vector.load %arg4[%c0_4, %c0_5] : memref<1x32xf32, #tpu.memory_space<vmem>>, vector<1x32xf32>
    %cst = arith.constant dense<0.000000e+00> : vector<8xf32>
    %4 = vector.multi_reduction <add>, %1, %cst [1] : vector<8x32xf32> to vector<8xf32>
    %5 = vector.shape_cast %4 : vector<8xf32> to vector<8x1xf32>
    %cst_6 = arith.constant 3.200000e+01 : f32
    %6 = vector.broadcast %cst_6 : f32 to vector<8x1xf32>
    %7 = arith.divf %5, %6 : vector<8x1xf32>
    %8 = vector.broadcast %7 : vector<8x1xf32> to vector<8x32xf32>
    %9 = arith.subf %1, %8 : vector<8x32xf32>
    %10 = arith.mulf %9, %9 : vector<8x32xf32>
    %cst_7 = arith.constant dense<0.000000e+00> : vector<8xf32>
    %11 = vector.multi_reduction <add>, %10, %cst_7 [1] : vector<8x32xf32> to vector<8xf32>
    %12 = vector.shape_cast %11 : vector<8xf32> to vector<8x1xf32>
    %cst_8 = arith.constant 3.200000e+01 : f32
    %13 = vector.broadcast %cst_8 : f32 to vector<8x1xf32>
    %14 = arith.divf %12, %13 : vector<8x1xf32>
    %15 = vector.broadcast %7 : vector<8x1xf32> to vector<8x32xf32>
    %16 = arith.subf %1, %15 : vector<8x32xf32>
    %cst_9 = arith.constant 9.99999974E-6 : f32
    %17 = vector.broadcast %cst_9 : f32 to vector<8x1xf32>
    %18 = arith.addf %14, %17 : vector<8x1xf32>
    %19 = math.rsqrt %18 : vector<8x1xf32>
    %20 = vector.broadcast %19 : vector<8x1xf32> to vector<8x32xf32>
    %21 = arith.mulf %16, %20 : vector<8x32xf32>
    %22 = vector.broadcast %2 : vector<1x32xf32> to vector<8x32xf32>
    %23 = arith.mulf %21, %22 : vector<8x32xf32>
    %24 = vector.broadcast %3 : vector<1x32xf32> to vector<8x32xf32>
    %25 = arith.addf %23, %24 : vector<8x32xf32>
    %26 = arith.truncf %25 : vector<8x32xf32> to vector<8x32xbf16>
    %c0_10 = arith.constant 0 : index
    %c0_11 = arith.constant 0 : index
    %c0_12 = arith.constant 0 : index
    %27 = vector.load %arg14[%c0_10, %c0_11, %c0_12] : memref<1x8x32xbf16, #tpu.memory_space<vmem>>, vector<1x8x32xbf16>
    %28 = vector.shape_cast %27 : vector<1x8x32xbf16> to vector<8x32xbf16>
    %29 = vector.shape_cast %26 : vector<8x32xbf16> to vector<1x8x32xbf16>
    tpu.vector_store %arg14[%c0_10, %c0_11, %c0_12], %29 {strides = array<i32>} : memref<1x8x32xbf16, #tpu.memory_space<vmem>>, vector<1x8x32xbf16>,
    %30 = arith.truncf %25 : vector<8x32xf32> to vector<8x32xbf16>
    %c0_13 = arith.constant 0 : index
    %c0_14 = arith.constant 0 : index
    %31 = vector.load %arg5[%c0_13, %c0_14] : memref<32x32xbf16, #tpu.memory_space<vmem>>, vector<32x32xbf16>
    %cst_15 = arith.constant dense<0.000000e+00> : vector<8x32xf32>
    %32 = tpu.matmul %30, %31, %cst_15 {dimension_numbers = #tpu.dot_dimension_numbers<[1], [0], [0], [1], [0, 0, 1, 1], [], []>} : vector<8x32xbf16>, vector<32x32xbf16>, vector<8x32xf32> -> vector<8x32xf32>
    %c0_16 = arith.constant 0 : index
    %c0_17 = arith.constant 0 : index
    %33 = vector.load %arg6[%c0_16, %c0_17] : memref<1x32xf32, #tpu.memory_space<vmem>>, vector<1x32xf32>
    %34 = vector.broadcast %33 : vector<1x32xf32> to vector<8x32xf32>
    %35 = arith.addf %32, %34 : vector<8x32xf32>
    %c0_18 = arith.constant 0 : index
    %c0_19 = arith.constant 0 : index
    %36 = vector.load %arg7[%c0_18, %c0_19] : memref<32x32xbf16, #tpu.memory_space<vmem>>, vector<32x32xbf16>
    %cst_20 = arith.constant dense<0.000000e+00> : vector<8x32xf32>
    %37 = tpu.matmul %30, %36, %cst_20 {dimension_numbers = #tpu.dot_dimension_numbers<[1], [0], [0], [1], [0, 0, 1, 1], [], []>} : vector<8x32xbf16>, vector<32x32xbf16>, vector<8x32xf32> -> vector<8x32xf32>
    %c0_21 = arith.constant 0 : index
    %c0_22 = arith.constant 0 : index
    %38 = vector.load %arg8[%c0_21, %c0_22] : memref<1x32xf32, #tpu.memory_space<vmem>>, vector<1x32xf32>
    %39 = vector.broadcast %38 : vector<1x32xf32> to vector<8x32xf32>
    %40 = arith.addf %37, %39 : vector<8x32xf32>
    %c0_23 = arith.constant 0 : index
    %c0_24 = arith.constant 0 : index
    %41 = vector.load %arg9[%c0_23, %c0_24] : memref<32x32xbf16, #tpu.memory_space<vmem>>, vector<32x32xbf16>
    %cst_25 = arith.constant dense<0.000000e+00> : vector<8x32xf32>
    %42 = tpu.matmul %30, %41, %cst_25 {dimension_numbers = #tpu.dot_dimension_numbers<[1], [0], [0], [1], [0, 0, 1, 1], [], []>} : vector<8x32xbf16>, vector<32x32xbf16>, vector<8x32xf32> -> vector<8x32xf32>
    %c0_26 = arith.constant 0 : index
    %c0_27 = arith.constant 0 : index
    %43 = vector.load %arg10[%c0_26, %c0_27] : memref<1x32xf32, #tpu.memory_space<vmem>>, vector<1x32xf32>
    %44 = vector.broadcast %43 : vector<1x32xf32> to vector<8x32xf32>
    %45 = arith.addf %42, %44 : vector<8x32xf32>
    %46 = vector.extract_strided_slice %35 {offsets = [0, 0], sizes = [8, 8], strides = [1, 1]} : vector<8x32xf32> to vector<8x8xf32>
    %47 = arith.truncf %46 : vector<8x8xf32> to vector<8x8xbf16>
    %c0_28 = arith.constant 0 : index
    %c0_29 = arith.constant 0 : index
    %c0_30 = arith.constant 0 : index
    %c0_31 = arith.constant 0 : index
    %48 = vector.load %arg11[%c0_28, %c0_29, %c0_30, %c0_31] : memref<1x4x8x8xbf16, #tpu.memory_space<vmem>>, vector<1x1x8x8xbf16>
    %49 = vector.shape_cast %48 : vector<1x1x8x8xbf16> to vector<8x8xbf16>
    %50 = vector.shape_cast %47 : vector<8x8xbf16> to vector<1x1x8x8xbf16>
    tpu.vector_store %arg11[%c0_28, %c0_29, %c0_30, %c0_31], %50 {strides = array<i32>} : memref<1x4x8x8xbf16, #tpu.memory_space<vmem>>, vector<1x1x8x8xbf16>,
    %51 = vector.extract_strided_slice %40 {offsets = [0, 0], sizes = [8, 8], strides = [1, 1]} : vector<8x32xf32> to vector<8x8xf32>
    %52 = arith.truncf %51 : vector<8x8xf32> to vector<8x8xbf16>
    %c0_32 = arith.constant 0 : index
    %c0_33 = arith.constant 0 : index
    %c0_34 = arith.constant 0 : index
    %c0_35 = arith.constant 0 : index
    %53 = vector.load %arg12[%c0_32, %c0_33, %c0_34, %c0_35] : memref<1x4x8x8xbf16, #tpu.memory_space<vmem>>, vector<1x1x8x8xbf16>
    %54 = vector.shape_cast %53 : vector<1x1x8x8xbf16> to vector<8x8xbf16>
    %55 = vector.shape_cast %52 : vector<8x8xbf16> to vector<1x1x8x8xbf16>
    tpu.vector_store %arg12[%c0_32, %c0_33, %c0_34, %c0_35], %55 {strides = array<i32>} : memref<1x4x8x8xbf16, #tpu.memory_space<vmem>>, vector<1x1x8x8xbf16>,
    %56 = vector.extract_strided_slice %45 {offsets = [0, 0], sizes = [8, 8], strides = [1, 1]} : vector<8x32xf32> to vector<8x8xf32>
    %57 = arith.truncf %56 : vector<8x8xf32> to vector<8x8xbf16>
    %c0_36 = arith.constant 0 : index
    %c0_37 = arith.constant 0 : index
    %c0_38 = arith.constant 0 : index
    %c0_39 = arith.constant 0 : index
    %58 = vector.load %arg13[%c0_36, %c0_37, %c0_38, %c0_39] : memref<1x4x8x8xbf16, #tpu.memory_space<vmem>>, vector<1x1x8x8xbf16>
    %59 = vector.shape_cast %58 : vector<1x1x8x8xbf16> to vector<8x8xbf16>
    %60 = vector.shape_cast %57 : vector<8x8xbf16> to vector<1x1x8x8xbf16>
    tpu.vector_store %arg13[%c0_36, %c0_37, %c0_38, %c0_39], %60 {strides = array<i32>} : memref<1x4x8x8xbf16, #tpu.memory_space<vmem>>, vector<1x1x8x8xbf16>,
    %61 = vector.extract_strided_slice %35 {offsets = [0, 8], sizes = [8, 8], strides = [1, 1]} : vector<8x32xf32> to vector<8x8xf32>
    %62 = arith.truncf %61 : vector<8x8xf32> to vector<8x8xbf16>
    %c0_40 = arith.constant 0 : index
    %c1 = arith.constant 1 : index
    %c0_41 = arith.constant 0 : index
    %c0_42 = arith.constant 0 : index
    %63 = vector.load %arg11[%c0_40, %c1, %c0_41, %c0_42] : memref<1x4x8x8xbf16, #tpu.memory_space<vmem>>, vector<1x1x8x8xbf16>
    %64 = vector.shape_cast %63 : vector<1x1x8x8xbf16> to vector<8x8xbf16>
    %65 = vector.shape_cast %62 : vector<8x8xbf16> to vector<1x1x8x8xbf16>
    tpu.vector_store %arg11[%c0_40, %c1, %c0_41, %c0_42], %65 {strides = array<i32>} : memref<1x4x8x8xbf16, #tpu.memory_space<vmem>>, vector<1x1x8x8xbf16>,
    %66 = vector.extract_strided_slice %40 {offsets = [0, 8], sizes = [8, 8], strides = [1, 1]} : vector<8x32xf32> to vector<8x8xf32>
    %67 = arith.truncf %66 : vector<8x8xf32> to vector<8x8xbf16>
    %c0_43 = arith.constant 0 : index
    %c1_44 = arith.constant 1 : index
    %c0_45 = arith.constant 0 : index
    %c0_46 = arith.constant 0 : index
    %68 = vector.load %arg12[%c0_43, %c1_44, %c0_45, %c0_46] : memref<1x4x8x8xbf16, #tpu.memory_space<vmem>>, vector<1x1x8x8xbf16>
    %69 = vector.shape_cast %68 : vector<1x1x8x8xbf16> to vector<8x8xbf16>
    %70 = vector.shape_cast %67 : vector<8x8xbf16> to vector<1x1x8x8xbf16>
    tpu.vector_store %arg12[%c0_43, %c1_44, %c0_45, %c0_46], %70 {strides = array<i32>} : memref<1x4x8x8xbf16, #tpu.memory_space<vmem>>, vector<1x1x8x8xbf16>,
    %71 = vector.extract_strided_slice %45 {offsets = [0, 8], sizes = [8, 8], strides = [1, 1]} : vector<8x32xf32> to vector<8x8xf32>
    %72 = arith.truncf %71 : vector<8x8xf32> to vector<8x8xbf16>
    %c0_47 = arith.constant 0 : index
    %c1_48 = arith.constant 1 : index
    %c0_49 = arith.constant 0 : index
    %c0_50 = arith.constant 0 : index
    %73 = vector.load %arg13[%c0_47, %c1_48, %c0_49, %c0_50] : memref<1x4x8x8xbf16, #tpu.memory_space<vmem>>, vector<1x1x8x8xbf16>
    %74 = vector.shape_cast %73 : vector<1x1x8x8xbf16> to vector<8x8xbf16>
    %75 = vector.shape_cast %72 : vector<8x8xbf16> to vector<1x1x8x8xbf16>
    tpu.vector_store %arg13[%c0_47, %c1_48, %c0_49, %c0_50], %75 {strides = array<i32>} : memref<1x4x8x8xbf16, #tpu.memory_space<vmem>>, vector<1x1x8x8xbf16>,
    %76 = vector.extract_strided_slice %35 {offsets = [0, 16], sizes = [8, 8], strides = [1, 1]} : vector<8x32xf32> to vector<8x8xf32>
    %77 = arith.truncf %76 : vector<8x8xf32> to vector<8x8xbf16>
    %c0_51 = arith.constant 0 : index
    %c2 = arith.constant 2 : index
    %c0_52 = arith.constant 0 : index
    %c0_53 = arith.constant 0 : index
    %78 = vector.load %arg11[%c0_51, %c2, %c0_52, %c0_53] : memref<1x4x8x8xbf16, #tpu.memory_space<vmem>>, vector<1x1x8x8xbf16>
    %79 = vector.shape_cast %78 : vector<1x1x8x8xbf16> to vector<8x8xbf16>
    %80 = vector.shape_cast %77 : vector<8x8xbf16> to vector<1x1x8x8xbf16>
    tpu.vector_store %arg11[%c0_51, %c2, %c0_52, %c0_53], %80 {strides = array<i32>} : memref<1x4x8x8xbf16, #tpu.memory_space<vmem>>, vector<1x1x8x8xbf16>,
    %81 = vector.extract_strided_slice %40 {offsets = [0, 16], sizes = [8, 8], strides = [1, 1]} : vector<8x32xf32> to vector<8x8xf32>
    %82 = arith.truncf %81 : vector<8x8xf32> to vector<8x8xbf16>
    %c0_54 = arith.constant 0 : index
    %c2_55 = arith.constant 2 : index
    %c0_56 = arith.constant 0 : index
    %c0_57 = arith.constant 0 : index
    %83 = vector.load %arg12[%c0_54, %c2_55, %c0_56, %c0_57] : memref<1x4x8x8xbf16, #tpu.memory_space<vmem>>, vector<1x1x8x8xbf16>
    %84 = vector.shape_cast %83 : vector<1x1x8x8xbf16> to vector<8x8xbf16>
    %85 = vector.shape_cast %82 : vector<8x8xbf16> to vector<1x1x8x8xbf16>
    tpu.vector_store %arg12[%c0_54, %c2_55, %c0_56, %c0_57], %85 {strides = array<i32>} : memref<1x4x8x8xbf16, #tpu.memory_space<vmem>>, vector<1x1x8x8xbf16>,
    %86 = vector.extract_strided_slice %45 {offsets = [0, 16], sizes = [8, 8], strides = [1, 1]} : vector<8x32xf32> to vector<8x8xf32>
    %87 = arith.truncf %86 : vector<8x8xf32> to vector<8x8xbf16>
    %c0_58 = arith.constant 0 : index
    %c2_59 = arith.constant 2 : index
    %c0_60 = arith.constant 0 : index
    %c0_61 = arith.constant 0 : index
    %88 = vector.load %arg13[%c0_58, %c2_59, %c0_60, %c0_61] : memref<1x4x8x8xbf16, #tpu.memory_space<vmem>>, vector<1x1x8x8xbf16>
    %89 = vector.shape_cast %88 : vector<1x1x8x8xbf16> to vector<8x8xbf16>
    %90 = vector.shape_cast %87 : vector<8x8xbf16> to vector<1x1x8x8xbf16>
    tpu.vector_store %arg13[%c0_58, %c2_59, %c0_60, %c0_61], %90 {strides = array<i32>} : memref<1x4x8x8xbf16, #tpu.memory_space<vmem>>, vector<1x1x8x8xbf16>,
    %91 = vector.extract_strided_slice %35 {offsets = [0, 24], sizes = [8, 8], strides = [1, 1]} : vector<8x32xf32> to vector<8x8xf32>
    %92 = arith.truncf %91 : vector<8x8xf32> to vector<8x8xbf16>
    %c0_62 = arith.constant 0 : index
    %c3 = arith.constant 3 : index
    %c0_63 = arith.constant 0 : index
    %c0_64 = arith.constant 0 : index
    %93 = vector.load %arg11[%c0_62, %c3, %c0_63, %c0_64] : memref<1x4x8x8xbf16, #tpu.memory_space<vmem>>, vector<1x1x8x8xbf16>
    %94 = vector.shape_cast %93 : vector<1x1x8x8xbf16> to vector<8x8xbf16>
    %95 = vector.shape_cast %92 : vector<8x8xbf16> to vector<1x1x8x8xbf16>
    tpu.vector_store %arg11[%c0_62, %c3, %c0_63, %c0_64], %95 {strides = array<i32>} : memref<1x4x8x8xbf16, #tpu.memory_space<vmem>>, vector<1x1x8x8xbf16>,
    %96 = vector.extract_strided_slice %40 {offsets = [0, 24], sizes = [8, 8], strides = [1, 1]} : vector<8x32xf32> to vector<8x8xf32>
    %97 = arith.truncf %96 : vector<8x8xf32> to vector<8x8xbf16>
    %c0_65 = arith.constant 0 : index
    %c3_66 = arith.constant 3 : index
    %c0_67 = arith.constant 0 : index
    %c0_68 = arith.constant 0 : index
    %98 = vector.load %arg12[%c0_65, %c3_66, %c0_67, %c0_68] : memref<1x4x8x8xbf16, #tpu.memory_space<vmem>>, vector<1x1x8x8xbf16>
    %99 = vector.shape_cast %98 : vector<1x1x8x8xbf16> to vector<8x8xbf16>
    %100 = vector.shape_cast %97 : vector<8x8xbf16> to vector<1x1x8x8xbf16>
    tpu.vector_store %arg12[%c0_65, %c3_66, %c0_67, %c0_68], %100 {strides = array<i32>} : memref<1x4x8x8xbf16, #tpu.memory_space<vmem>>, vector<1x1x8x8xbf16>,
    %101 = vector.extract_strided_slice %45 {offsets = [0, 24], sizes = [8, 8], strides = [1, 1]} : vector<8x32xf32> to vector<8x8xf32>
    %102 = arith.truncf %101 : vector<8x8xf32> to vector<8x8xbf16>
    %c0_69 = arith.constant 0 : index
    %c3_70 = arith.constant 3 : index
    %c0_71 = arith.constant 0 : index
    %c0_72 = arith.constant 0 : index
    %103 = vector.load %arg13[%c0_69, %c3_70, %c0_71, %c0_72] : memref<1x4x8x8xbf16, #tpu.memory_space<vmem>>, vector<1x1x8x8xbf16>
    %104 = vector.shape_cast %103 : vector<1x1x8x8xbf16> to vector<8x8xbf16>
    %105 = vector.shape_cast %102 : vector<8x8xbf16> to vector<1x1x8x8xbf16>
    tpu.vector_store %arg13[%c0_69, %c3_70, %c0_71, %c0_72], %105 {strides = array<i32>} : memref<1x4x8x8xbf16, #tpu.memory_space<vmem>>, vector<1x1x8x8xbf16>,
    return
  }
  func.func @transform_0(%arg0: i32, %arg1: i32) -> (i32, i32, i32) {
    %c0_i32 = arith.constant 0 : i32
    %c0_i32_0 = arith.constant 0 : i32
    return %arg0, %arg1, %c0_i32 : i32, i32, i32
  }
  func.func @transform_1(%arg0: i32, %arg1: i32) -> (i32, i32) {
    %c0_i32 = arith.constant 0 : i32
    %c0_i32_0 = arith.constant 0 : i32
    %c0_i32_1 = arith.constant 0 : i32
    return %c0_i32, %c0_i32_0 : i32, i32
  }
  func.func @transform_2(%arg0: i32, %arg1: i32) -> (i32, i32) {
    %c0_i32 = arith.constant 0 : i32
    %c0_i32_0 = arith.constant 0 : i32
    %c0_i32_1 = arith.constant 0 : i32
    return %c0_i32, %c0_i32_0 : i32, i32
  }
  func.func @transform_3(%arg0: i32, %arg1: i32) -> (i32, i32) {
    %c0_i32 = arith.constant 0 : i32
    %c0_i32_0 = arith.constant 0 : i32
    %c0_i32_1 = arith.constant 0 : i32
    return %c0_i32, %c0_i32_0 : i32, i32
  }
  func.func @transform_4(%arg0: i32, %arg1: i32) -> (i32, i32) {
    %c0_i32 = arith.constant 0 : i32
    %c0_i32_0 = arith.constant 0 : i32
    %c0_i32_1 = arith.constant 0 : i32
    return %c0_i32, %c0_i32_0 : i32, i32
  }
  func.func @transform_5(%arg0: i32, %arg1: i32) -> (i32, i32) {
    %c0_i32 = arith.constant 0 : i32
    %c0_i32_0 = arith.constant 0 : i32
    %c0_i32_1 = arith.constant 0 : i32
    return %c0_i32, %c0_i32_0 : i32, i32
  }
  func.func @transform_6(%arg0: i32, %arg1: i32) -> (i32, i32) {
    %c0_i32 = arith.constant 0 : i32
    %c0_i32_0 = arith.constant 0 : i32
    %c0_i32_1 = arith.constant 0 : i32
    return %c0_i32, %c0_i32_0 : i32, i32
  }
  func.func @transform_7(%arg0: i32, %arg1: i32) -> (i32, i32) {
    %c0_i32 = arith.constant 0 : i32
    %c0_i32_0 = arith.constant 0 : i32
    %c0_i32_1 = arith.constant 0 : i32
    return %c0_i32, %c0_i32_0 : i32, i32
  }
  func.func @transform_8(%arg0: i32, %arg1: i32) -> (i32, i32) {
    %c0_i32 = arith.constant 0 : i32
    %c0_i32_0 = arith.constant 0 : i32
    %c0_i32_1 = arith.constant 0 : i32
    return %c0_i32, %c0_i32_0 : i32, i32
  }
  func.func @transform_9(%arg0: i32, %arg1: i32) -> (i32, i32, i32, i32) {
    %c0_i32 = arith.constant 0 : i32
    %c0_i32_0 = arith.constant 0 : i32
    %c0_i32_1 = arith.constant 0 : i32
    return %arg0, %c0_i32, %arg1, %c0_i32_0 : i32, i32, i32, i32
  }
  func.func @transform_10(%arg0: i32, %arg1: i32) -> (i32, i32, i32, i32) {
    %c0_i32 = arith.constant 0 : i32
    %c0_i32_0 = arith.constant 0 : i32
    %c0_i32_1 = arith.constant 0 : i32
    return %arg0, %c0_i32, %arg1, %c0_i32_0 : i32, i32, i32, i32
  }
  func.func @transform_11(%arg0: i32, %arg1: i32) -> (i32, i32, i32, i32) {
    %c0_i32 = arith.constant 0 : i32
    %c0_i32_0 = arith.constant 0 : i32
    %c0_i32_1 = arith.constant 0 : i32
    return %arg0, %c0_i32, %arg1, %c0_i32_0 : i32, i32, i32, i32
  }
  func.func @transform_12(%arg0: i32, %arg1: i32) -> (i32, i32, i32) {
    %c0_i32 = arith.constant 0 : i32
    %c0_i32_0 = arith.constant 0 : i32
    return %arg0, %arg1, %c0_i32 : i32, i32, i32
  }
}

</mosaic_0001>

<bundles_post_ra>
// kernel: tpu_custom_call.1
= control target key start
LH: loop header
LB: loop body
LE: loop exit
PB: predicated region body
PF: predicated region fallthrough
CT: control target
= control target key end

     0   :  { %6 = vsyncpa [#allocation3], 0  ;;  %s115_s0 = inlined_call_operand.hbm [shape: f32[8,128], index: 0, kind: input, shape index: {}]   ;;  %s116_s1 = inlined_call_operand.hbm [shape: f32[8,128], index: 1, kind: output, shape index: {}]  }
   0x1   :  { %7 = vsyncpa [#allocation4], 0  ;;  %s13_s8 = sshll.u32 %s115_s0, 4  ;;  %s97_s9 = smov [#allocation2]   ;;  %s14_s8 = int_to_ptr.hbm [resolvable:$true] %s13_s8 }
   0x2   :  { %s15_s10 = sshll.u32 %s97_s9, 4  ;;  %s16_s10 = int_to_ptr.vmem [resolvable:$true] %s15_s10 }
   0x3   :  { %18 = dma.hbm_to_vmem [thread:$0]  %s14_s8, 128, %s16_s10, [#allocation3]  }
   0x4   :  { %93 = dma.done.wait [#allocation3], 128  }
   0x5   :  { %94 = vsyncadd [#allocation3], 4294967168  ;;  %s98_s11 = smov [#allocation5]   ;;  %s33_s15 = sshll.u32 %s116_s1, 4  ;;  %v23_v0 = vld [vmem:[#allocation2] sm:$0xff]  ;;  %s34_s15 = int_to_ptr.hbm [resolvable:$true] %s33_s15 }
   0x6   :  { %s31_s12 = sshll.u32 %s98_s11, 4  ;;  %v24_v1 = vadd.f32 1.0, %v23_v0  ;;  %s32_s12 = int_to_ptr.vmem [resolvable:$true] %s31_s12 }
   0x8   :  { %25 = vst [vmem:[#allocation5] sm:$0xff] %v24_v1 }
   0x9   :  { %36 = dma.vmem_to_hbm [thread:$0]  %s32_s12, 128, %s34_s15, [#allocation4]  }
   0xa   :  { %95 = dma.done.wait [#allocation4], 128  }
   0xb   :  { %96 = vsyncadd [#allocation4], 4294967168 }
   0xc   :  { %41 = vsyncpa [#allocation3], 1 }
   0xd   :  { %42 = vsyncpa [#allocation4], 1 }

// kernel: tpu_custom_call.1
= control target key start
LH: loop header
LB: loop body
LE: loop exit
PB: predicated region body
PF: predicated region fallthrough
CT: control target
= control target key end

     0   :  { %s1979_s0 = inlined_call_operand.hbm [shape: f32[2,8,32], index: 0, kind: input, shape index: {}]   ;;  %s1980_s1 = inlined_call_operand.hbm [shape: f32[1,32], index: 1, kind: input, shape index: {}]   ;;  %s1981_s2 = inlined_call_operand.vmem [shape: f32[1,32], index: 2, kind: input, shape index: {}]   ;;  %s1982_s3 = inlined_call_operand.hbm [shape: bf16[32,32], index: 3, kind: input, shape index: {}]   ;;  %s1983_s4 = inlined_call_operand.vmem [shape: f32[1,32], index: 4, kind: input, shape index: {}]   ;;  %s1984_s5 = inlined_call_operand.hbm [shape: bf16[32,32], index: 5, kind: input, shape index: {}]   ;;  %s1985_s6 = inlined_call_operand.vmem [shape: f32[1,32], index: 6, kind: input, shape index: {}]   ;;  %s1986_s7 = inlined_call_operand.hbm [shape: bf16[32,32], index: 7, kind: input, shape index: {}]   ;;  %s1987_s8 = inlined_call_operand.vmem [shape: f32[1,32], index: 8, kind: input, shape index: {}]   ;;  %s1988_s9 = inlined_call_operand.hbm [shape: bf16[2,4,8,8], index: 9, kind: output, shape index: {0}]   ;;  %s1989_s10 = inlined_call_operand.hbm [shape: bf16[2,4,8,8], index: 10, kind: output, shape index: {1}]   ;;  %s1990_s11 = inlined_call_operand.hbm [shape: bf16[2,4,8,8], index: 11, kind: output, shape index: {2}]   ;;  %s1991_s12 = inlined_call_operand.hbm [shape: bf16[2,8,32], index: 12, kind: output, shape index: {3}]  }
   0x1   :  { %1998 = sst [smem:[#allocation25_spill]] %s1979_s0 }
   0x2   :  { %1999 = sst [smem:[#allocation26_spill]] %s1980_s1 }
   0x3   :  { %2000 = sst [smem:[#allocation27_spill]] %s1981_s2 }
   0x4   :  { %2001 = sst [smem:[#allocation28_spill]] %s1982_s3 }
   0x5   :  { %2002 = sst [smem:[#allocation29_spill]] %s1983_s4 }
   0x6   :  { %2003 = sst [smem:[#allocation30_spill]] %s1984_s5 }
   0x7   :  { %2004 = sst [smem:[#allocation31_spill]] %s1985_s6 }
   0x8   :  { %2005 = sst [smem:[#allocation32_spill]] %s1986_s7 }
   0x9   :  { %2006 = sst [smem:[#allocation33_spill]] %s1987_s8 }
   0xa   :  { %2007 = sst [smem:[#allocation34_spill]] %s1988_s9 }
   0xb   :  { %18 = vsyncpa [#allocation3], 0 }
   0xc   :  { %20 = vsyncpa [#allocation3 + $0x1], 0 }
   0xd   :  { %21 = vsyncpa [#allocation6], 0 }
   0xe   :  { %22 = vsyncpa [#allocation9], 0 }
   0xf   :  { %23 = vsyncpa [#allocation4], 0 }
  0x10   :  { %25 = vsyncpa [#allocation4 + $0x1], 0 }
  0x11   :  { %26 = vsyncpa [#allocation13], 0 }
  0x12   :  { %28 = vsyncpa [#allocation13 + $0x1], 0 }
  0x13   :  { %29 = vsyncpa [#allocation16], 0 }
  0x14   :  { %31 = vsyncpa [#allocation16 + $0x1], 0  ;;  %s1678_s21 = smov 0   ;;  %s1680_s22 = smov 0  }
  0x15   :  { %s1682_s23 = smov 0   ;;  %s1684_s24 = smov 0  }
  0x16   :  { %s1686_s25 = smov 0   ;;  %s1688_s26 = smov 0  }
  0x17 LB: > { %2008 = sst [smem:[#allocation23_spill]] %s1595_s25  ;;  %s1709_s27 = sadd.s32 4294967295, %s1599_s26   ;;  %s1599_s26 = sphi %s1688_s26, %s37_s26   ;;  %s1595_s25 = sphi %s1686_s25, %s2028_s25   ;;  %s1591_s24 = sphi %s1684_s24, %s2027_s24   ;;  %s1587_s23 = sphi %s1682_s23, %s2031_s23   ;;  %s1583_s22 = sphi %s1680_s22, %s2030_s22   ;;  %s1579_s21 = sphi %s1678_s21, %s2029_s21  }
  0x18   : > { %p1056_p0 = scmp.ge.s32.totalorder %s1599_s26, 1  ;;  %p72_p1 = scmp.eq.s32.totalorder %s1709_s27, 0 }
  0x19   : > { %p362_p2 = scmp.lt.s32.totalorder %s1599_s26, 3  ;;  %s2009_s1 = sld [smem:[#allocation26_spill]] }
  0x1a   : > { %p1061_p4 = scmp.ge.s32.totalorder %s1599_s26, 2  ;;  %s1601_s14 = smov [#allocation5]  }
  0x1b   : > { %p1717_p3 = pnand %p1056_p0, %p362_p2  ;;  %s376_s15 = sshll.u32 %s1601_s14, 4  ;;  %s377_s15 = int_to_ptr.vmem [resolvable:$true] %s376_s15 }
  0x1c   : > { %s2012_s5 = sld [smem:[#allocation30_spill]]  ;;  %s1602_s20 = smov [#allocation8]  }
  0x1d   : > { %p1158_p5 = pneg %p1717_p3  ;;  %s407_s28 = sshll.u32 %s1602_s20, 4  ;;  %s408_s28 = int_to_ptr.vmem [resolvable:$true] %s407_s28 }
  0x1e   : > { %s2013_s3 = sld [smem:[#allocation28_spill]]  ;;  %s1603_s9 = smov 64  }
  0x1f   : > { %s374_s30 = sshll.u32 %s2009_s1, 4  ;;  %p1726_p6 = pnand %p1158_p5, %p72_p1  ;;  %s375_s30 = int_to_ptr.hbm [resolvable:$true] %s374_s30 }
  0x20   : > { %s1604_s17 = smov 4   ;;  %s2014_s7 = sld [smem:[#allocation32_spill]] }
  0x21   : > { %1161 = dma.hbm_to_vmem [thread:$0]  (!%p1726_p6), %s375_s30, 16, %s377_s15, [#allocation6]  }
  0x22   : > { %s405_s19 = sshll.u32 %s2012_s5, 4  ;;  %s1605_s20 = smov [#allocation7]   ;;  %s406_s19 = int_to_ptr.hbm [resolvable:$true] %s405_s19 }
  0x23   : > { %1167 = dma.hbm_to_vmem [thread:$0]  (!%p1726_p6), %s406_s19, 256, %s408_s28, [#allocation9], %s1603_s9, %s1603_s9, %s1604_s17  }
  0x24   : > { %s388_s1 = sshll.u32 %s2013_s3, 4  ;;  %s390_s29 = sshll.u32 %s1605_s20, 4  ;;  %s389_s1 = int_to_ptr.hbm [resolvable:$true] %s388_s1  ;;  %s391_s29 = int_to_ptr.vmem [resolvable:$true] %s390_s29 }
  0x25   : > { %1164 = dma.hbm_to_vmem [thread:$0]  (!%p1726_p6), %s389_s1, 256, %s391_s29, [#allocation6], %s1603_s9, %s1603_s9, %s1604_s17  }
  0x26   : > { %s422_s15 = sshll.u32 %s2014_s7, 4  ;;  %s1606_s14 = smov [#allocation10]   ;;  %s423_s15 = int_to_ptr.hbm [resolvable:$true] %s422_s15 }
  0x27   : > { %s424_s3 = sshll.u32 %s1606_s14, 4  ;;  %s49_s19 = sadd.s32 1, %s1595_s25  ;;  %s425_s3 = int_to_ptr.vmem [resolvable:$true] %s424_s3 }
  0x28   : > { %1170 = dma.hbm_to_vmem [thread:$0]  (!%p1726_p6), %s423_s15, 256, %s425_s3, [#allocation9], %s1603_s9, %s1603_s9, %s1604_s17  }
  0x29   : > { %s1994_s28 = sadd.s32 4294967294, %s1599_s26   ;;  %p51_p7 = scmp.ge.s32.totalorder %s49_s19, 2 }
  0x2a   : > { %s58_s18 = sadd.s32 1, %s1587_s23  ;;  %p65_p8 = scmp.ne.s32.totalorder %s1587_s23, %s1583_s22 }
  0x2b   : > { %s2033_s19 = smov (%p51_p7, %s49_s19), 0  ;;  %p66_p9 = scmp.eq.s32.totalorder %s1599_s26, 0 }
  0x2c   : > { %2015 = sst [smem:[#allocation24_spill]] %s2033_s19  ;;  %p71_p10 = scmp.ne.s32.totalorder %s1583_s22, %s1579_s21 }
  0x2d   : > { %s53_s1 = ssub.s32 %s1595_s25, %s2033_s19  ;;  %p265_p11 = scmp.eq.s32.totalorder %s1709_s27, 1 }
  0x2e   : > { %p56_p12 = scmp.eq.s32.totalorder %s53_s1, 0  ;;  %p1762_p13 = por %p72_p1, %p71_p10 }
  0x2f   : > { %p1766_p0 = por %p265_p11, %p65_p8  ;;  %p271_p2 = scmp.eq.s32.totalorder %s1994_s28, 1 }
  0x30   : > { %s1773_s9 = scalar_select %p56_p12, %s1587_s23, %s58_s18  }
  0x31   : > { %p67_p5 = por %p66_p9, %p65_p8  ;;  %p1775_p6 = por %p271_p2, %p71_p10 }
  0x32   : > { %s441_s30 = sand.u32 1, %s1587_s23   ;;  %s1063_s15 = sshll.u32 %s1595_s25, 3 }
  0x33   : > { %p1192_p7 = scmp.lt.s32.totalorder %s1599_s26, 2  ;;  %s1062_s20 = sshll.u32 %s441_s30, 3 }
  0x34   : > { %s2019_s0 = sld [smem:[#allocation25_spill]]  ;;  %s445_s7 = scalar_lea.vmem [#allocation2], %s1062_s20 }
  0x35   : > { %s454_s19 = sshll.u32 %s445_s7, 4  ;;  %p1172_p11 = pnand %p1192_p7, %p67_p5  ;;  %s455_s19 = int_to_ptr.vmem [resolvable:$true] %s454_s19 }
  0x36   : > { %s442_s18 = scalar_lea.sflag [#allocation3], %s441_s30  ;;  %s1788_s28 = sand.u32 (!%p1717_p3), 1, %s1583_s22  }
  0x37   : > { %s1065_s25 = sshll.u32 (!%p1717_p3), %s1788_s28, 3  ;;  %s466_s29 = scalar_lea.sflag (!%p1717_p3), [#allocation3], %s1788_s28 }
  0x38   : > { %463 = sbr.rel (%p1717_p3) target bundleno = 626 (0x272), region = 56 }
  0x3a   : > { %s450_s1 = scalar_lea.hbm %s2019_s0, %s1063_s15  ;;  %s469_s15 = scalar_lea.vmem (!%p1717_p3), [#allocation2], %s1065_s25 }
  0x3b   : > { %s452_s5 = sshll.u32 %s450_s1, 4  ;;  %s453_s5 = int_to_ptr.hbm [resolvable:$true] %s452_s5 }
  0x3c   : > { %1174 = dma.hbm_to_vmem [thread:$0]  (!%p1172_p11), %s453_s5, 128, %s455_s19, %s442_s18  }
  0x3d   : > { %1554 = dma.done.wait (%p1762_p13), %s466_s29, 128  }
  0x3e   : > { %1556 = vsyncadd (%p1762_p13), %s466_s29, 4294967168 }
  0x3f   : > { %1558 = dma.done.wait (%p72_p1), [#allocation6], 272  }
  0x40   : > { %1560 = vsyncadd (%p72_p1), [#allocation6], 4294967024 }
  0x41   : > { %1562 = dma.done.wait (%p72_p1), [#allocation9], 512  }
  0x42   : > { %1564 = vsyncadd (%p72_p1), [#allocation9], 4294966784  ;;  %vm550_vm0 = vcmask 261120   ;;  %v547_v0 = vld [vmem:[%s469_s15] sm:$0xff]  ;;  %v1607_v2 = vmov 32.0   ;;  %v1123_v17 = vld [vmem:[#allocation7] sm:$0xff] }
  0x43   : > { %v551_v1 = vsel %vm550_vm0, %v547_v0, 0.0  ;;  %1263 = vrcp.f32 %v1607_v2  ;;  %v1124_v14 = vld [vmem:[#allocation7 + $0x8] sm:$0xff]  ;;  %v1126_v15 = vld [vmem:[#allocation8 + $0x8] sm:$0xff]  ;;  %v1125_v18 = vld [vmem:[#allocation8] sm:$0xff]  ;;  %s2020_s2 = sld [smem:[#allocation27_spill]]  ;;  %s1073_s25 = sshll.u32 %s1788_s28, 2 }
  0x44   : > { %552 = vadd.xlane.f32.xlu0 %v551_v1  ;;  %v1128_v16 = vld [vmem:[#allocation10 + $0x8] sm:$0xff]  ;;  %620 = vmatpush.bf16.msra.mxu0 %v1124_v14  ;;  %v1127_v19 = vld [vmem:[#allocation10] sm:$0xff]  ;;  %v1258_v29 = vld [vmem:[#allocation5] ss:$0 sm:$0xff]  ;;  %vm589_vm5 = vcmask 257024   ;;  %s1812_s13 = scalar_lea.vmem [#allocation15], %s1073_s25 }
  0x45   : > { %653 = vmatpush.bf16.msra.mxu1 %v1126_v15  ;;  %686 = vmatpush.bf16.msra.mxu2 %v1128_v16  ;;  %s2021_s4 = sld [smem:[#allocation29_spill]]  ;;  %s1070_s14 = sshll.u32 %s1788_s28, 4  ;;  %vm694_vm6 = vcmask 60416  }
  0x46   : > { %s2022_s6 = sld [smem:[#allocation31_spill]]  ;;  %s1826_s29 = scalar_lea.vmem [#allocation11], %s1070_s14 }
  0x47   : > { %s2023_s8 = sld [smem:[#allocation33_spill]]  ;;  %s1996_s15 = smov 104  }
  0x48   : > { %621 = vmatpush.bf16.msra.mxu0 %v1123_v17  ;;  %s1609_s5 = smov 120   ;;  %s1831_s7 = scalar_lea.vmem [#allocation12], %s1070_s14 }
  0x49   : > { %v1264_v3 = vpop.eup %1263  ;;  %654 = vmatpush.bf16.msra.mxu1 %v1125_v18  ;;  %687 = vmatpush.bf16.msra.mxu2 %v1127_v19  ;;  %v1259_v32 = vld [vmem:[%s2020_s2] ss:$0 sm:$0xff]  ;;  %s1835_s25 = scalar_lea.vmem [#allocation14], %s1070_s14  ;;  %s1610_s19 = smov 112  }
  0x4a   : > { %v555_v4 = vmul.f32 32.0, %v1264_v3  ;;  %vm559_vm1 = vweird.f32 %v1264_v3  ;;  %s1120_s16 = sshll.u32 %s1591_s24, 2  ;;  %s831_s18 = sshll.u32 %s1812_s13, 4  ;;  %s832_s18 = int_to_ptr.vmem [resolvable:$true] %s831_s18 }
  0x4b   : > { %v1260_v36 = vld [vmem:[%s2021_s4] ss:$0 sm:$0xff]  ;;  %s829_s1 = scalar_lea.hbm %s1991_s12, %s1120_s16 }
  0x4c   : > { %v556_v5 = vsub.f32 1.0, %v555_v4  ;;  %v1261_v37 = vld [vmem:[%s2022_s6] ss:$0 sm:$0xff]  ;;  %s833_s14 = sshll.u32 %s829_s1, 4  ;;  %s834_s14 = int_to_ptr.hbm [resolvable:$true] %s833_s14 }
  0x4d   : > { %v1262_v44 = vld [vmem:[%s2023_s8] ss:$0 sm:$0xff]  ;;  %s1431_s0 = sshra.s32 %s834_s14, 4  ;;  %s1432_s0 = int_to_ptr.hbm [resolvable:$true] %s1431_s0 }
  0x4e   : > { %v557_v6 = vmul.f32 %v1264_v3, %v556_v5  ;;  %s1433_s2 = scalar_lea.hbm %s1432_s0, 4  ;;  %p1438_p9 = scmp.lt.s32.totalorder %s1432_s0, %s1991_s12 }
  0x4f   : > { %p1434_p1 = scmp.ne.s32.totalorder %s1432_s0, %s1433_s2 }
  0x50   : > { %v558_v7 = vadd.f32 %v1264_v3, %v557_v6 }
  0x51   : > { %p1435_p3 = pnand %p1434_p1, %p1766_p0 }
  0x52   : > { %v560_v8 = vsel %vm559_vm1, %v1264_v3, %v558_v7 }
  0x53   : > { %p1436_p8 = pneg %p1435_p3 }
  0xb7   : > { %v553_v9 = vpop.xlane.xlu0 %552 }
  0xb8   : > { %v561_v10 = vmul.f32 %v560_v8, %v553_v9 }
  0xba   : > { %v562_v11 = vsub.f32 %v547_v0, %v561_v10 }
  0xbc   : > { %v563_v12 = vmul.f32 %v562_v11, %v562_v11 }
  0xbe   : > { %v564_v13 = vsel %vm550_vm0, %v563_v12, 0.0 }
  0xbf   : > { %565 = vadd.xlane.f32.xlu0 %v564_v13 }
 0x132   : > { %v566_v20 = vpop.xlane.xlu0 %565 }
 0x133   : > { %v567_v21 = vmul.f32 %v566_v20, %v560_v8 }
 0x135   : > { %v568_v22 = vadd.f32 1e-05, %v567_v21 }
 0x137   : > { %1265 = vrsqrt.f32 %v568_v22  ;;  %vm575_vm3 = vweird.f32 %v568_v22 }
 0x13d   : > { %v1266_v23 = vpop.eup %1265 }
 0x13e   : > { %v570_v24 = vmul.f32 %v1266_v23, %v568_v22  ;;  %vm576_vm2 = vweird.f32 %v1266_v23 }
 0x13f   : > { %vm577_vm4 = vmor %vm575_vm3, %vm576_vm2 }
 0x140   : > { %v571_v25 = vmul.f32 %v1266_v23, %v570_v24 }
 0x142   : > { %v572_v26 = vmul.f32 0.5, %v571_v25 }
 0x144   : > { %v573_v27 = vsub.f32 1.5, %v572_v26 }
 0x146   : > { %v574_v28 = vmul.f32 %v1266_v23, %v573_v27 }
 0x148   : > { %v578_v30 = vsel %vm577_vm4, %v1266_v23, %v574_v28 }
 0x149   : > { %v579_v31 = vmul.f32 %v578_v30, %v562_v11 }
 0x14b   : > { %v583_v33 = vmul.f32 %v1258_v29, %v579_v31 }
 0x14d   : > { %v587_v34 = vadd.f32 %v1259_v32, %v583_v33 }
 0x14f   : > { %v588_v35 = vpack.c.bf16 %v587_v34, %v587_v34 }
 0x151   : > { %1082 = vmatmul.msk.bf16.vlgmr.msra.gmra.mxu0 %vm550_vm0, %v588_v35  ;;  %1091 = vmatmul.msk.bf16.vlgmr.msra.gmra.mxu1 %vm550_vm0, %v588_v35  ;;  %590 = vst.msk [vmem:[%s1812_s13] sm:$0xf] %vm589_vm5, %v588_v35 }
 0x152   : > { %1100 = vmatmul.msk.bf16.vlgmr.msra.gmra.mxu2 %vm550_vm0, %v588_v35 }
 0x1ce   : > { %v623_v38 = vpop.f32.mrf.mxu0  ;;  %v656_v39 = vpop.f32.mrf.mxu1 }
 0x1cf   : > { %v624_v40 = vadd.f32 %v1260_v36, %v623_v38  ;;  %v657_v41 = vadd.f32 %v1261_v37, %v656_v39 }
 0x1d1   : > { %v693_v42 = vpack.c.bf16 %v624_v40, %v624_v40  ;;  %v696_v43 = vpack.c.bf16 %v657_v41, %v657_v41 }
 0x1d3   : > { %695 = vst.msk [vmem:[%s1826_s29] sm:$0xf] %vm694_vm6, %v693_v42  ;;  %738 = vrot.lane.b32.xlu2 %v696_v43, %s1996_s15  ;;  %707 = vrot.lane.b32.xlu1 %v696_v43, %s1609_s5  ;;  %s764_s15 = scalar_lea.sflag [#allocation16], %s1788_s28 }
 0x1d4   : > { %697 = vst.msk [vmem:[%s1831_s7] sm:$0xf] %vm694_vm6, %v696_v43 }
 0x1d5   : > { %v689_v45 = vpop.f32.mrf.mxu2 }
 0x1d6   : > { %v690_v46 = vadd.f32 %v1262_v44, %v689_v45  ;;  %v625_v47 = vpop.f32.mrf.mxu0  ;;  %v658_v48 = vpop.f32.mrf.mxu1 }
 0x1d8   : > { %v698_v49 = vpack.c.bf16 %v690_v46, %v690_v46 }
 0x1da   : > { %699 = vst.msk [vmem:[%s1835_s25] sm:$0xf] %vm694_vm6, %v698_v49  ;;  %713 = vrot.lane.b32.xlu0 %v698_v49, %s1609_s5 }
 0x1db   : > { %723 = vrot.lane.b32.xlu1 %v696_v43, %s1610_s19  ;;  %701 = vrot.lane.b32.xlu2 %v693_v42, %s1609_s5 }
 0x1dd   : > { %v691_v50 = vpop.f32.mrf.mxu2 }
 0x1e3   : > { %718 = vrot.lane.b32.xlu1 %v693_v42, %s1610_s19  ;;  %728 = vrot.lane.b32.xlu2 %v698_v49, %s1610_s19  ;;  %s1437_s19 = scalar_lea.hbm %s1991_s12, 8 }
 0x1e4   : > { %p1439_p10 = scmp.lt.s32.totalorder %s1437_s19, %s1433_s2 }
 0x1e6   : > { %p1440_p12 = por %p1439_p10, %p1438_p9 }
 0x1e8   : > { %p1441_p13 = pnand %p1440_p12, %p1436_p8 }
 0x1ea   : > { %1444 = shalt.err (!%p1441_p13)
}
 0x1eb   : > { %1153 = dma.vmem_to_hbm [thread:$0]  (%p1766_p0), %s832_s18, 64, %s834_s14, %s764_s15  }
 0x1ec   : > { %s2024_s4 = smov 104   ;;  %s1864_s0 = sshll.u32 %s1591_s24, 4 }
 0x1ed   : > { %733 = vrot.lane.b32.xlu1 %v693_v42, %s2024_s4  ;;  %743 = vrot.lane.b32.xlu2 %v698_v49, %s2024_s4  ;;  %s795_s2 = sshll.u32 %s1831_s7, 4  ;;  %s794_s13 = scalar_lea.hbm %s1989_s10, %s1864_s0  ;;  %s1880_s2 = int_to_ptr.vmem [resolvable:$true] %s795_s2 }
 0x1ee   : > { %s812_s24 = scalar_lea.hbm %s1990_s11, %s1864_s0  ;;  %s753_s30 = sand.u32 1, %s1709_s27  }
 0x1ef   : > { %s1882_s20 = sshll.u32 %s794_s13, 4  ;;  %s813_s1 = sshll.u32 %s1835_s25, 4  ;;  %s798_s20 = int_to_ptr.hbm [resolvable:$true] %s1882_s20  ;;  %s1888_s1 = int_to_ptr.vmem [resolvable:$true] %s813_s1 }
 0x1f0   : > { %s1885_s18 = sshll.u32 %s812_s24, 4  ;;  %s1895_s27 = scalar_lea.sflag [#allocation13], %s753_s30  ;;  %s816_s18 = int_to_ptr.hbm [resolvable:$true] %s1885_s18 }
 0x1f1   : > { %s1459_s14 = sshra.s32 %s798_s20, 4  ;;  %s1465_s6 = scalar_lea.hbm %s1989_s10, 32  ;;  %s1460_s14 = int_to_ptr.hbm [resolvable:$true] %s1459_s14 }
 0x1f2   : > { %s1461_s5 = scalar_lea.hbm %s1460_s14, 16  ;;  %p1466_p11 = scmp.lt.s32.totalorder %s1460_s14, %s1989_s10 }
 0x1f3   : > { %p1462_p2 = scmp.ne.s32.totalorder %s1460_s14, %s1461_s5  ;;  %p1467_p1 = scmp.lt.s32.totalorder %s1465_s6, %s1461_s5 }
 0x1f5   : > { %p1463_p5 = pnand %p1462_p2, %p1766_p0  ;;  %p1468_p3 = por %p1467_p1, %p1466_p11 }
 0x1f7   : > { %p1464_p7 = pneg %p1463_p5 }
 0x1f9   : > { %p1469_p8 = pnand %p1468_p3, %p1464_p7 }
 0x22d   : > { %v739_v51 = vpop.permute.xlu2 %738 }
 0x22e   : > { %1108 = vst.msk [vmem:[%s1831_s7 + $0xc] sm:$0xf] %vm694_vm6, %v739_v51 }
 0x235   : > { %v702_v52 = vpop.permute.xlu2 %701 }
 0x236   : > { %1101 = vst.msk [vmem:[%s1826_s29 + $0x4] sm:$0xf] %vm694_vm6, %v702_v52 }
 0x23d   : > { %v729_v53 = vpop.permute.xlu2 %728 }
 0x23e   : > { %1106 = vst.msk [vmem:[%s1835_s25 + $0x8] sm:$0xf] %vm694_vm6, %v729_v53 }
 0x245   : > { %v708_v54 = vpop.permute.xlu1 %707 }
 0x246   : > { %1102 = vst.msk [vmem:[%s1831_s7 + $0x4] sm:$0xf] %vm694_vm6, %v708_v54 }
 0x247   : > { %v744_v55 = vpop.permute.xlu2 %743 }
 0x248   : > { %1109 = vst.msk [vmem:[%s1835_s25 + $0xc] sm:$0xf] %vm694_vm6, %v744_v55 }
 0x24c   : > { %v714_v56 = vpop.permute.xlu0 %713 }
 0x24d   : > { %1103 = vst.msk [vmem:[%s1835_s25 + $0x4] sm:$0xf] %vm694_vm6, %v714_v56  ;;  %v724_v57 = vpop.permute.xlu1 %723 }
 0x24e   : > { %1105 = vst.msk [vmem:[%s1831_s7 + $0x8] sm:$0xf] %vm694_vm6, %v724_v57 }
 0x24f   : > { %1472 = shalt.err (!%p1469_p8)
}
 0x250   : > { %s1611_s7 = smov 64   ;;  %s1612_s25 = smov 4  }
 0x251   : > { %1151 = dma.vmem_to_hbm [thread:$0]  (%p1766_p0), %s1880_s2, 256, %s798_s20, %s1895_s27, %s1611_s7, %s1611_s7, %s1612_s25  }
 0x252   : > { %s1487_s15 = sshra.s32 %s816_s18, 4  ;;  %s1493_s14 = scalar_lea.hbm %s1990_s11, 32  ;;  %s1488_s15 = int_to_ptr.hbm [resolvable:$true] %s1487_s15 }
 0x253   : > { %s1489_s16 = scalar_lea.hbm %s1488_s15, 16  ;;  %p1494_p13 = scmp.lt.s32.totalorder %s1488_s15, %s1990_s11 }
 0x254   : > { %p1490_p9 = scmp.ne.s32.totalorder %s1488_s15, %s1489_s16  ;;  %p1495_p2 = scmp.lt.s32.totalorder %s1493_s14, %s1489_s16 }
 0x256   : > { %p1491_p10 = pnand %p1490_p9, %p1766_p0  ;;  %p1496_p5 = por %p1495_p2, %p1494_p13 }
 0x258   : > { %p1492_p12 = pneg %p1491_p10 }
 0x25a   : > { %p1497_p7 = pnand %p1496_p5, %p1492_p12 }
 0x25c   : > { %1500 = shalt.err (!%p1497_p7)
}
 0x25d   : > { %1152 = dma.vmem_to_hbm [thread:$0]  (%p1766_p0), %s1888_s1, 256, %s816_s18, %s1895_s27, %s1611_s7, %s1611_s7, %s1612_s25   ;;  %v719_v58 = vpop.permute.xlu1 %718 }
 0x25e   : > { %1104 = vst.msk [vmem:[%s1826_s29 + $0x8] sm:$0xf] %vm694_vm6, %v719_v58  ;;  %s2025_s4 = sld [smem:[#allocation34_spill]]  ;;  %s777_s8 = sshll.u32 %s1826_s29, 4  ;;  %s778_s8 = int_to_ptr.vmem [resolvable:$true] %s777_s8 }
 0x25f   : > { %s749_s15 = scalar_lea.sflag [#allocation4], %s1788_s28 }
 0x264   : > { %s776_s6 = scalar_lea.hbm %s2025_s4, %s1864_s0  ;;  %s1521_s27 = scalar_lea.hbm %s2025_s4, 32 }
 0x265   : > { %s779_s13 = sshll.u32 %s776_s6, 4  ;;  %v734_v59 = vpop.permute.xlu1 %733  ;;  %s780_s13 = int_to_ptr.hbm [resolvable:$true] %s779_s13 }
 0x266   : > { %1107 = vst.msk [vmem:[%s1826_s29 + $0xc] sm:$0xf] %vm694_vm6, %v734_v59  ;;  %s1515_s16 = sshra.s32 %s780_s13, 4  ;;  %s1516_s16 = int_to_ptr.hbm [resolvable:$true] %s1515_s16 }
 0x267   : > { %s1517_s24 = scalar_lea.hbm %s1516_s16, 16  ;;  %p1522_p8 = scmp.lt.s32.totalorder %s1516_s16, %s2025_s4 }
 0x268   : > { %p1518_p11 = scmp.ne.s32.totalorder %s1516_s16, %s1517_s24  ;;  %p1523_p9 = scmp.lt.s32.totalorder %s1521_s27, %s1517_s24 }
 0x26a   : > { %p1519_p1 = pnand %p1518_p11, %p1766_p0  ;;  %p1524_p10 = por %p1523_p9, %p1522_p8 }
 0x26c   : > { %p1520_p3 = pneg %p1519_p1 }
 0x26e   : > { %p1525_p12 = pnand %p1524_p10, %p1520_p3 }
 0x270   : > { %1528 = shalt.err (!%p1525_p12)
}
 0x271   : > { %1150 = dma.vmem_to_hbm [thread:$0]  (%p1766_p0), %s778_s8, 256, %s780_s13, %s749_s15, %s1611_s7, %s1611_s7, %s1612_s25  }
 0x272 PF: > { %s845_s28 = sand.u32 1, %s1579_s21   ;;  %p1176_p13 = pnand %p1061_p4, %p1775_p6 }
 0x273   : > { %s846_s29 = scalar_lea.sflag [#allocation4], %s845_s28 }
 0x274   : > { %p1177_p2 = pneg %p1176_p13 }
 0x276   : > { %1566 = dma.done.wait (%p1177_p2), %s846_s29, 256  }
 0x277   : > { %1568 = vsyncadd (%p1177_p2), %s846_s29, 4294967040  ;;  %s2026_s14 = sadd.s32 4294967294, %s1599_s26  }
 0x278   : > { %s855_s5 = sand.u32 1, %s2026_s14  }
 0x279   : > { %s856_s3 = scalar_lea.sflag [#allocation13], %s855_s5 }
 0x27a   : > { %1570 = dma.done.wait (%p1177_p2), %s856_s3, 512  }
 0x27b   : > { %1572 = vsyncadd (%p1177_p2), %s856_s3, 4294966784  ;;  %s876_s19 = scalar_lea.sflag [#allocation16], %s845_s28 }
 0x27c   : > { %1574 = dma.done.wait (%p1177_p2), %s876_s19, 64  }
 0x27d   : > { %1576 = vsyncadd (%p1177_p2), %s876_s19, 4294967232  ;;  %s37_s26 = sadd.s32 1, %s1599_s26   ;;  %s2027_s24 = sld [smem:[#allocation23_spill]] }
 0x27e   : > { %p34_p0 = scmp.ge.s32.totalorder %s37_s26, 4   ;;  %s2028_s25 = sld [smem:[#allocation24_spill]] }
 0x27f   : > { %s2029_s21 = smov %s1583_s22  ;;  %s2030_s22 = smov %s1587_s23 }
 0x280   : > { %s2031_s23 = smov %s1773_s9  ;;  %36 = sbr.rel (!%p34_p0) target bundleno = 23 (0x17), region = 175 }
 0x285   :  { %882 = vsyncpa [#allocation3], 1 }
 0x286   :  { %884 = vsyncpa [#allocation3 + $0x1], 1 }
 0x287   :  { %885 = vsyncpa [#allocation6], 1 }
 0x288   :  { %886 = vsyncpa [#allocation9], 1 }
 0x289   :  { %887 = vsyncpa [#allocation4], 1 }
 0x28a   :  { %889 = vsyncpa [#allocation4 + $0x1], 1 }
 0x28b   :  { %890 = vsyncpa [#allocation13], 1 }
 0x28c   :  { %892 = vsyncpa [#allocation13 + $0x1], 1 }
 0x28d   :  { %893 = vsyncpa [#allocation16], 1 }
 0x28e   :  { %895 = vsyncpa [#allocation16 + $0x1], 1 }

</bundles_post_ra>
